<compile_context>
chip_gen: v7x
topology: tpu7x:2x2x1
jax: 0.10.0
libtpu: 0.0.40
codegen_flags: <defaults>
</compile_context>

<pallas_src>
import functools

import jax
import jax.numpy as jnp
from jax import lax
from jax.experimental import pallas as pl
from jax.experimental.pallas import tpu as pltpu


def _round_up(x, m):
    return (x + m - 1) // m * m


def c2d_kernel(x_ref, wc_ref, bc_ref, va_ref, vb_ref, out_ref, acc_ref, *, nc):
    """Grid = (batch_tiles, k_tiles); k (contraction over D) is the last axis."""
    k = pl.program_id(1)

    @pl.when(k == 0)
    def _():
        acc_ref[...] = jnp.zeros_like(acc_ref)

    # ---- classifier partial matmul (the only hot matmul) ----
    acc_ref[...] += jnp.dot(x_ref[...], wc_ref[...],
                            preferred_element_type=jnp.float32)

    @pl.when(k == pl.num_programs(1) - 1)
    def _():
        # Padded logit columns carry a -1e30 bias -> never win max/argmax.
        logits = acc_ref[...] + bc_ref[...]                       # (TB, NC_PAD)
        row_max = jnp.max(logits, axis=1, keepdims=True)          # reused as maxclassifier
        col_ids = lax.broadcasted_iota(jnp.int32, logits.shape, 1)

        # first-index argmax via equality + min (matches jnp.argmax for finite logits)
        masked = jnp.where(logits == row_max, col_ids, logits.shape[1])
        amax = jnp.min(masked, axis=1, keepdims=True)             # (TB, 1)
        onehot = (col_ids == amax).astype(jnp.float32)            # (TB, NC_PAD)

        # Folded saliency+detector heads: a = va[argmax], b = vb[argmax]
        # (detector biases already folded into va/vb on the host).
        a = jnp.sum(onehot * va_ref[...], axis=1, keepdims=True)  # (TB, 1)
        b = jnp.sum(onehot * vb_ref[...], axis=1, keepdims=True)  # (TB, 1)
        is_adv = jnp.where(jnp.abs(a) > jnp.abs(b), a, b)
        n1 = (is_adv + 1.0) * row_max                             # (TB, 1)

        # Single lane-dense store: [logits | N_1 | padding]  (padding sliced off on host)
        out_ref[...] = jnp.where(col_ids == nc, n1, logits)


def c2d_forward(x, params, *, map_channels_start, map_channels,
                compute_dtype=jnp.float32):
    """x: (B, C, H, W) NCHW.  Returns (B, num_classes + 1) float32.

    compute_dtype=jnp.bfloat16 halves the dominant x/Wc HBM streams on v6e/v7x
    (MXU still accumulates in f32)."""
    B, C, H, W = x.shape
    hw = H * W
    D = C * hw
    wc, bc, wd1, bd1, wd2, bd2 = params
    NC = wc.shape[1]

    # ---- host-side fold (f32, algebraically exact) ----
    wc32 = wc.astype(jnp.float32)
    half = map_channels // 2
    c0 = map_channels_start * hw
    m1 = wc32[c0:c0 + half * hw, :].T @ wd1.astype(jnp.float32)                      # (NC, 2)
    m2 = wc32[c0 + half * hw:c0 + map_channels * hw, :].T @ wd2.astype(jnp.float32)  # (NC, 2)
    va = (m1[:, 0] - m1[:, 1]) + (bd1[0, 0] - bd1[0, 1])   # bias folds: onehot row-sum == 1
    vb = (m2[:, 0] - m2[:, 1]) + (bd2[0, 0] - bd2[0, 1])

    # ---- padded / tiled shapes: lane-dense output, (8,128)-aligned operands ----
    NC_PAD = _round_up(NC + 1, 128)
    TB = min(_round_up(B, 8), 256)
    B_pad = _round_up(B, TB)
    TK = 512 if D >= 1024 else _round_up(D, 128)
    D_pad = _round_up(D, TK)

    NEG = jnp.float32(-1e30)
    x_p = jnp.zeros((B_pad, D_pad), compute_dtype).at[:B, :D].set(
        x.reshape(B, D).astype(compute_dtype))
    wc_p = jnp.zeros((D_pad, NC_PAD), compute_dtype).at[:D, :NC].set(
        wc.astype(compute_dtype))
    bc_p = jnp.full((1, NC_PAD), NEG, jnp.float32).at[0, :NC].set(
        bc.reshape(-1).astype(jnp.float32))
    va_p = jnp.zeros((1, NC_PAD), jnp.float32).at[0, :NC].set(va)
    vb_p = jnp.zeros((1, NC_PAD), jnp.float32).at[0, :NC].set(vb)

    grid = (B_pad // TB, D_pad // TK)
    itemsize = jnp.dtype(compute_dtype).itemsize
    cost = pl.CostEstimate(
        flops=2 * B_pad * D_pad * NC_PAD,
        transcendentals=0,
        bytes_accessed=(B_pad * D_pad + grid[0] * D_pad * NC_PAD) * itemsize
                       + B_pad * NC_PAD * 4)

    out_pad = pl.pallas_call(
        functools.partial(c2d_kernel, nc=NC),
        out_shape=jax.ShapeDtypeStruct((B_pad, NC_PAD), jnp.float32),
        grid_spec=pltpu.PrefetchScalarGridSpec(
            num_scalar_prefetch=0,
            grid=grid,
            in_specs=[
                pl.BlockSpec((TB, TK), lambda i, k: (i, k)),       # x tile
                pl.BlockSpec((TK, NC_PAD), lambda i, k: (k, 0)),   # Wc tile
                pl.BlockSpec((1, NC_PAD), lambda i, k: (0, 0)),    # bc
                pl.BlockSpec((1, NC_PAD), lambda i, k: (0, 0)),    # va (det1 fold)
                pl.BlockSpec((1, NC_PAD), lambda i, k: (0, 0)),    # vb (det2 fold)
            ],
            out_specs=pl.BlockSpec((TB, NC_PAD), lambda i, k: (i, 0)),
            scratch_shapes=[pltpu.VMEM((TB, NC_PAD), jnp.float32)]),
        compiler_params=pltpu.CompilerParams(
            dimension_semantics=("parallel", "arbitrary"),
            vmem_limit_bytes=32 * 1024 * 1024),
        cost_estimate=cost,
    )(x_p, wc_p, bc_p, va_p, vb_p)

    return out_pad[:B, :NC + 1]


def c2d_reference(x, params, *, map_channels_start, map_channels):
    B, C, H, W = x.shape
    hw = H * W
    wc, bc, wd1, bd1, wd2, bd2 = params
    xf = x.reshape(B, -1)
    logits = xf @ wc + bc
    amax = jnp.argmax(logits, axis=1)
    sal = wc.T[amax]
    half = map_channels // 2
    c0 = map_channels_start * hw
    s1 = sal[:, c0:c0 + half * hw]
    s2 = sal[:, c0 + half * hw:c0 + map_channels * hw]
    d1 = s1 @ wd1 + bd1
    d2 = s2 @ wd2 + bd2
    a = d1[:, 0] - d1[:, 1]
    b = d2[:, 0] - d2[:, 1]
    out = a * (jnp.abs(a) > jnp.abs(b)) + b * (jnp.abs(a) <= jnp.abs(b))
    n1 = (out + 1.0) * jnp.max(logits, axis=1)
    return jnp.concatenate([logits, n1[:, None]], axis=1)


if __name__ == "__main__":
    # Small shapes consistent with the module's forward semantics.
    B, C, H, W = 2, 4, 16, 16
    NUM_CLASSES = 10
    MAP_CHANNELS_START = 0
    MAP_CHANNELS = 4                 # opt.map_channels (split in half per detector)
    D = C * H * W
    D_HALF = (MAP_CHANNELS // 2) * H * W

    key = jax.random.PRNGKey(0)
    kx, kwc, kbc, kw1, kb1, kw2, kb2 = jax.random.split(key, 7)

    x = jax.random.normal(kx, (B, C, H, W), dtype=jnp.float32)

    wc = jax.random.normal(kwc, (D, NUM_CLASSES), dtype=jnp.float32) * 0.05
    bc = jax.random.normal(kbc, (1, NUM_CLASSES), dtype=jnp.float32) * 0.05
    wd1 = jax.random.normal(kw1, (D_HALF, 2), dtype=jnp.float32) * 0.05
    bd1 = jax.random.normal(kb1, (1, 2), dtype=jnp.float32) * 0.05
    wd2 = jax.random.normal(kw2, (D_HALF, 2), dtype=jnp.float32) * 0.05
    bd2 = jax.random.normal(kb2, (1, 2), dtype=jnp.float32) * 0.05
    params = (wc, bc, wd1, bd1, wd2, bd2)

    # f32 path: exact-semantics check against the unfused pure-JAX reference.
    out = c2d_forward(x, params,
                      map_channels_start=MAP_CHANNELS_START,
                      map_channels=MAP_CHANNELS)
    out = jax.block_until_ready(out)

    ref = c2d_reference(x, params,
                        map_channels_start=MAP_CHANNELS_START,
                        map_channels=MAP_CHANNELS)
    assert out.shape == (B, NUM_CLASSES + 1)
    assert jnp.allclose(out, ref, rtol=1e-3, atol=1e-4), "mismatch vs reference"

    # bf16-streaming path (production option for v6e/v7x): smoke test only.
    out_bf16 = c2d_forward(x, params,
                           map_channels_start=MAP_CHANNELS_START,
                           map_channels=MAP_CHANNELS,
                           compute_dtype=jnp.bfloat16)
    out_bf16 = jax.block_until_ready(out_bf16)
    assert out_bf16.shape == (B, NUM_CLASSES + 1)
    assert bool(jnp.isfinite(out_bf16).all())

    print("KERNEL_OK")
</pallas_src>

<mosaic_0001>
module attributes {stable_mosaic.version = 11 : i64} {
  func.func @c2d_kernel(%arg0: i32, %arg1: i32, %arg2: memref<8x512xf32, #tpu.memory_space<vmem>>, %arg3: memref<512x128xf32, #tpu.memory_space<vmem>>, %arg4: memref<1x128xf32, #tpu.memory_space<vmem>>, %arg5: memref<1x128xf32, #tpu.memory_space<vmem>>, %arg6: memref<1x128xf32, #tpu.memory_space<vmem>>, %arg7: memref<8x128xf32, #tpu.memory_space<vmem>>, %arg8: memref<8x128xf32, #tpu.memory_space<vmem>>) attributes {dimension_semantics = [#tpu.dimension_semantics<parallel>, #tpu.dimension_semantics<arbitrary>], iteration_bounds = array<i64: 1, 2>, scalar_prefetch = 0 : i64, scratch_operands = 1 : i64, tpu.core_type = #tpu.core_type<tc>, window_params = [{transform_indices = @transform_0, window_bounds = array<i64: 8, 512>}, {transform_indices = @transform_1, window_bounds = array<i64: 512, 128>}, {pipeline_mode = #tpu.pipeline_mode<synchronous>, transform_indices = @transform_2, window_bounds = array<i64: 1, 128>}, {pipeline_mode = #tpu.pipeline_mode<synchronous>, transform_indices = @transform_3, window_bounds = array<i64: 1, 128>}, {pipeline_mode = #tpu.pipeline_mode<synchronous>, transform_indices = @transform_4, window_bounds = array<i64: 1, 128>}, {transform_indices = @transform_5, window_bounds = array<i64: 8, 128>}]} {
    %c0_i32 = arith.constant 0 : i32
    %0 = arith.cmpi eq, %arg1, %c0_i32 : i32
    %1 = arith.extui %0 : i1 to i32
    %c0_i32_0 = arith.constant 0 : i32
    %2 = arith.cmpi ne, %1, %c0_i32_0 : i32
    scf.if %2 {
      %cst_9 = arith.constant 0.000000e+00 : f32
      %12 = vector.broadcast %cst_9 : f32 to vector<8x128xf32>
      %c0_10 = arith.constant 0 : index
      %c0_11 = arith.constant 0 : index
      %13 = vector.load %arg8[%c0_10, %c0_11] : memref<8x128xf32, #tpu.memory_space<vmem>>, vector<8x128xf32>
      tpu.vector_store %arg8[%c0_10, %c0_11], %12 {strides = array<i32>} : memref<8x128xf32, #tpu.memory_space<vmem>>, vector<8x128xf32>,
    } else {
    }
    %c0 = arith.constant 0 : index
    %c0_1 = arith.constant 0 : index
    %3 = vector.load %arg8[%c0, %c0_1] : memref<8x128xf32, #tpu.memory_space<vmem>>, vector<8x128xf32>
    %c0_2 = arith.constant 0 : index
    %c0_3 = arith.constant 0 : index
    %4 = vector.load %arg2[%c0_2, %c0_3] : memref<8x512xf32, #tpu.memory_space<vmem>>, vector<8x512xf32>
    %c0_4 = arith.constant 0 : index
    %c0_5 = arith.constant 0 : index
    %5 = vector.load %arg3[%c0_4, %c0_5] : memref<512x128xf32, #tpu.memory_space<vmem>>, vector<512x128xf32>
    %cst = arith.constant dense<0.000000e+00> : vector<8x128xf32>
    %6 = tpu.matmul %4, %5, %cst {dimension_numbers = #tpu.dot_dimension_numbers<[1], [0], [0], [1], [0, 0, 1, 1], [], []>} : vector<8x512xf32>, vector<512x128xf32>, vector<8x128xf32> -> vector<8x128xf32>
    %7 = arith.addf %3, %6 : vector<8x128xf32>
    %c0_6 = arith.constant 0 : index
    %c0_7 = arith.constant 0 : index
    %8 = vector.load %arg8[%c0_6, %c0_7] : memref<8x128xf32, #tpu.memory_space<vmem>>, vector<8x128xf32>
    tpu.vector_store %arg8[%c0_6, %c0_7], %7 {strides = array<i32>} : memref<8x128xf32, #tpu.memory_space<vmem>>, vector<8x128xf32>,
    %c1_i32 = arith.constant 1 : i32
    %9 = arith.cmpi eq, %arg1, %c1_i32 : i32
    %10 = arith.extui %9 : i1 to i32
    %c0_i32_8 = arith.constant 0 : i32
    %11 = arith.cmpi ne, %10, %c0_i32_8 : i32
    scf.if %11 {
      %c0_9 = arith.constant 0 : index
      %c0_10 = arith.constant 0 : index
      %12 = vector.load %arg8[%c0_9, %c0_10] : memref<8x128xf32, #tpu.memory_space<vmem>>, vector<8x128xf32>
      %c0_11 = arith.constant 0 : index
      %c0_12 = arith.constant 0 : index
      %13 = vector.load %arg4[%c0_11, %c0_12] : memref<1x128xf32, #tpu.memory_space<vmem>>, vector<1x128xf32>
      %14 = vector.broadcast %13 : vector<1x128xf32> to vector<8x128xf32>
      %15 = arith.addf %12, %14 : vector<8x128xf32>
      %cst_13 = arith.constant dense<0xFF800000> : vector<8xf32>
      %16 = vector.multi_reduction <maximumf>, %15, %cst_13 [1] : vector<8x128xf32> to vector<8xf32>
      %17 = vector.shape_cast %16 : vector<8xf32> to vector<8x1xf32>
      %18 = tpu.iota {dimensions = array<i32: 1>} : vector<8x128xi32>
      %19 = vector.broadcast %17 : vector<8x1xf32> to vector<8x128xf32>
      %20 = arith.cmpf oeq, %15, %19 : vector<8x128xf32>
      %c128_i32 = arith.constant 128 : i32
      %21 = vector.broadcast %c128_i32 : i32 to vector<8x128xi32>
      %22 = arith.select %20, %18, %21 : vector<8x128xi1>, vector<8x128xi32>
      %cst_14 = arith.constant dense<2147483647> : vector<8xi32>
      %23 = vector.multi_reduction <minsi>, %22, %cst_14 [1] : vector<8x128xi32> to vector<8xi32>
      %24 = vector.shape_cast %23 : vector<8xi32> to vector<8x1xi32>
      %25 = vector.broadcast %24 : vector<8x1xi32> to vector<8x128xi32>
      %26 = arith.cmpi eq, %18, %25 : vector<8x128xi32>
      %27 = arith.extui %26 : vector<8x128xi1> to vector<8x128xi32>
      %28 = arith.sitofp %27 : vector<8x128xi32> to vector<8x128xf32>
      %c0_15 = arith.constant 0 : index
      %c0_16 = arith.constant 0 : index
      %29 = vector.load %arg5[%c0_15, %c0_16] : memref<1x128xf32, #tpu.memory_space<vmem>>, vector<1x128xf32>
      %30 = vector.broadcast %29 : vector<1x128xf32> to vector<8x128xf32>
      %31 = arith.mulf %28, %30 : vector<8x128xf32>
      %cst_17 = arith.constant dense<0.000000e+00> : vector<8xf32>
      %32 = vector.multi_reduction <add>, %31, %cst_17 [1] : vector<8x128xf32> to vector<8xf32>
      %33 = vector.shape_cast %32 : vector<8xf32> to vector<8x1xf32>
      %c0_18 = arith.constant 0 : index
      %c0_19 = arith.constant 0 : index
      %34 = vector.load %arg6[%c0_18, %c0_19] : memref<1x128xf32, #tpu.memory_space<vmem>>, vector<1x128xf32>
      %35 = vector.broadcast %34 : vector<1x128xf32> to vector<8x128xf32>
      %36 = arith.mulf %28, %35 : vector<8x128xf32>
      %cst_20 = arith.constant dense<0.000000e+00> : vector<8xf32>
      %37 = vector.multi_reduction <add>, %36, %cst_20 [1] : vector<8x128xf32> to vector<8xf32>
      %38 = vector.shape_cast %37 : vector<8xf32> to vector<8x1xf32>
      %39 = math.absf %33 : vector<8x1xf32>
      %40 = math.absf %38 : vector<8x1xf32>
      %41 = arith.cmpf ogt, %39, %40 : vector<8x1xf32>
      %42 = arith.select %41, %33, %38 : vector<8x1xi1>, vector<8x1xf32>
      %cst_21 = arith.constant 1.000000e+00 : f32
      %43 = vector.broadcast %cst_21 : f32 to vector<8x1xf32>
      %44 = arith.addf %42, %43 : vector<8x1xf32>
      %45 = arith.mulf %44, %17 : vector<8x1xf32>
      %c10_i32 = arith.constant 10 : i32
      %46 = vector.broadcast %c10_i32 : i32 to vector<8x128xi32>
      %47 = arith.cmpi eq, %18, %46 : vector<8x128xi32>
      %48 = vector.shape_cast %45 : vector<8x1xf32> to vector<8x1xf32>
      %49 = vector.broadcast %48 : vector<8x1xf32> to vector<8x128xf32>
      %50 = arith.select %47, %49, %15 : vector<8x128xi1>, vector<8x128xf32>
      %c0_22 = arith.constant 0 : index
      %c0_23 = arith.constant 0 : index
      %51 = vector.load %arg7[%c0_22, %c0_23] : memref<8x128xf32, #tpu.memory_space<vmem>>, vector<8x128xf32>
      tpu.vector_store %arg7[%c0_22, %c0_23], %50 {strides = array<i32>} : memref<8x128xf32, #tpu.memory_space<vmem>>, vector<8x128xf32>,
    } else {
    }
    return
  }
  func.func @transform_0(%arg0: i32, %arg1: i32) -> (i32, i32) {
    %c0_i32 = arith.constant 0 : i32
    return %arg0, %arg1 : i32, i32
  }
  func.func @transform_1(%arg0: i32, %arg1: i32) -> (i32, i32) {
    %c0_i32 = arith.constant 0 : i32
    %c0_i32_0 = arith.constant 0 : i32
    return %arg1, %c0_i32 : i32, i32
  }
  func.func @transform_2(%arg0: i32, %arg1: i32) -> (i32, i32) {
    %c0_i32 = arith.constant 0 : i32
    %c0_i32_0 = arith.constant 0 : i32
    %c0_i32_1 = arith.constant 0 : i32
    return %c0_i32, %c0_i32_0 : i32, i32
  }
  func.func @transform_3(%arg0: i32, %arg1: i32) -> (i32, i32) {
    %c0_i32 = arith.constant 0 : i32
    %c0_i32_0 = arith.constant 0 : i32
    %c0_i32_1 = arith.constant 0 : i32
    return %c0_i32, %c0_i32_0 : i32, i32
  }
  func.func @transform_4(%arg0: i32, %arg1: i32) -> (i32, i32) {
    %c0_i32 = arith.constant 0 : i32
    %c0_i32_0 = arith.constant 0 : i32
    %c0_i32_1 = arith.constant 0 : i32
    return %c0_i32, %c0_i32_0 : i32, i32
  }
  func.func @transform_5(%arg0: i32, %arg1: i32) -> (i32, i32) {
    %c0_i32 = arith.constant 0 : i32
    %c0_i32_0 = arith.constant 0 : i32
    return %arg0, %c0_i32 : i32, i32
  }
}

</mosaic_0001>

<bundles_post_ra>
// kernel: tpu_custom_call.1
= control target key start
LH: loop header
LB: loop body
LE: loop exit
PB: predicated region body
PF: predicated region fallthrough
CT: control target
= control target key end

     0   :  { %10 = vsyncpa [#allocation4], 0  ;;  %s1363_s0 = inlined_call_operand.hbm [shape: f32[8,1024], index: 0, kind: input, shape index: {}]   ;;  %s1364_s1 = inlined_call_operand.hbm [shape: f32[1024,128], index: 1, kind: input, shape index: {}]   ;;  %s1365_s2 = inlined_call_operand.vmem [shape: f32[1,128], index: 2, kind: input, shape index: {}]   ;;  %s1366_s3 = inlined_call_operand.vmem [shape: f32[1,128], index: 3, kind: input, shape index: {}]   ;;  %s1367_s4 = inlined_call_operand.vmem [shape: f32[1,128], index: 4, kind: input, shape index: {}]   ;;  %s1368_s5 = inlined_call_operand.hbm [shape: f32[8,128], index: 5, kind: output, shape index: {}]  }
   0x1   :  { %12 = vsyncpa [#allocation4 + $0x1], 0 }
   0x2   :  { %13 = vsyncpa [#allocation7], 0 }
   0x3   :  { %15 = vsyncpa [#allocation7 + $0x1], 0 }
   0x4   :  { %16 = vsyncpa [#allocation5], 0  ;;  %s1081_s18 = smov 0   ;;  %s1083_s19 = smov 0  }
   0x5   :  { %s1085_s20 = smov 0   ;;  %s1087_s21 = smov 0  }
   0x6   :  { %s1089_s22 = smov 0   ;;  %s1091_s23 = smov 0  }
   0x7 LB: > { %s669_s24 = sadd.s32 4294967295, %s1042_s23   ;;  %s31_s25 = sadd.s32 1, %s1038_s22  ;;  %s1042_s23 = sphi %s1091_s23, %s22_s23   ;;  %s1038_s22 = sphi %s1089_s22, %s1382_s22   ;;  %s1034_s21 = sphi %s1087_s21, %s1381_s21   ;;  %s1030_s20 = sphi %s1085_s20, %s1380_s20   ;;  %s1026_s19 = sphi %s1083_s19, %s1379_s19   ;;  %s1022_s18 = sphi %s1081_s18, %s1378_s18  }
   0x8   : > { %p32_p0 = scmp.ge.s32.totalorder %s31_s25, 2  ;;  %s43_s26 = sadd.s32 1, %s1030_s20 }
   0x9   : > { %p50_p1 = scmp.ne.s32.totalorder %s1030_s20, %s1026_s19  ;;  %p51_p2 = scmp.eq.s32.totalorder %s1042_s23, 0 }
   0xa   : > { %s1384_s25 = smov (%p32_p0, %s31_s25), 0  ;;  %p56_p4 = scmp.ne.s32.totalorder %s1026_s19, %s1022_s18 }
   0xb   : > { %p1117_p3 = por %p51_p2, %p50_p1  ;;  %s39_s28 = ssub.s32 %s1038_s22, %s1384_s25 }
   0xc   : > { %p57_p5 = scmp.eq.s32.totalorder %s669_s24, 0  ;;  %p41_p6 = scmp.eq.s32.totalorder %s39_s28, 0 }
   0xd   : > { %p842_p8 = scmp.lt.s32.totalorder %s1042_s23, 2  ;;  %s1135_s6 = sand.u32 1, %s1030_s20  }
   0xe   : > { %p1126_p7 = por %p57_p5, %p56_p4  ;;  %s691_s7 = sshll.u32 %s1038_s22, 9 }
   0xf   : > { %s1132_s30 = scalar_select %p41_p6, %s1030_s20, %s43_s26  }
  0x10   : > { %s1371_s29 = scalar_select %p1126_p7, 1, 0 }
  0x11   : > { %s672_s8 = sshll.u32 %s1135_s6, 5  ;;  %s1142_s11 = scalar_lea.hbm %s1363_s0, %s691_s7 }
  0x12   : > { %s208_s12 = scalar_lea.vmem [#allocation3], %s672_s8  ;;  %p1146_p9 = pnand %p842_p8, %p1117_p3 }
  0x13   : > { %s218_s13 = sshll.u32 %s208_s12, 4  ;;  %s205_s15 = scalar_lea.sflag [#allocation4], %s1135_s6  ;;  %s1150_s13 = int_to_ptr.vmem [resolvable:$true] %s218_s13 }
  0x14   : > { %s898_s16 = scalar_lea.hbm %s1142_s11, 512  ;;  %p900_p13 = pneg %p1146_p9 }
  0x15   : > { %p899_p12 = scmp.ne.s32.totalorder %s1142_s11, %s898_s16  ;;  %s903_s26 = scalar_lea.hbm %s1363_s0, 1024 }
  0x16   : > { %p904_p2 = scmp.lt.u32.totalorder %s1142_s11, %s1363_s0  ;;  %p905_p3 = scmp.lt.u32.totalorder %s903_s26, %s898_s16 }
  0x17   : > { %p901_p0 = pnand %p900_p13, %p899_p12  ;;  %p907_p5 = scmp.lt.u32.totalorder %s898_s16, %s1142_s11 }
  0x18   : > { %p906_p4 = por %p905_p3, %p904_p2 }
  0x19   : > { %p902_p1 = pneg %p901_p0 }
  0x1a   : > { %p908_p6 = por %p907_p5, %p906_p4 }
  0x1c   : > { %p909_p8 = pnand %p908_p6, %p902_p1 }
  0x1e   : > { %912 = shalt.err (!%p909_p8)
}
  0x1f   : > { %s913_s7 = scalar_lea.vmem %s1150_s13, 512  ;;  %s1044_s8 = smov [#allocation3]  }
  0x20   : > { %p914_p12 = scmp.ne.s32.totalorder %s1150_s13, %s913_s7  ;;  %s918_s9 = sshll.u32 %s1044_s8, 4  ;;  %s919_s9 = int_to_ptr.vmem [resolvable:$false] %s918_s9 }
  0x21   : > { %s920_s10 = scalar_lea.vmem %s919_s9, 1024  ;;  %p921_p11 = scmp.lt.s32.totalorder %s1150_s13, %s919_s9 }
  0x22   : > { %p916_p0 = pnand %p914_p12, %p900_p13  ;;  %p922_p2 = scmp.lt.s32.totalorder %s920_s10, %s913_s7 }
  0x24   : > { %p917_p10 = pneg %p916_p0  ;;  %p923_p3 = por %p922_p2, %p921_p11 }
  0x26   : > { %p924_p4 = pnand %p923_p3, %p917_p10 }
  0x28   : > { %927 = shalt.err (!%p924_p4)
}
  0x29   : > { %838 = dma.hbm_to_vmem [thread:$0]  (!%p1146_p9), %s1142_s11, 512, %s1150_s13, %s205_s15  }
  0x2a   : > { %p1373_p1 = scmp.lt.s32.totalorder %s1042_s23, 3  ;;  %p1374_p5 = scmp.ge.s32.totalorder %s1042_s23, 1 }
  0x2b   : > { %s675_s16 = sshll.u32 %s1135_s6, 9  ;;  %s692_s17 = sshll.u32 %s1038_s22, 13 }
  0x2c   : > { %p1184_p6 = pnand %p1374_p5, %p1373_p1  ;;  %s1193_s27 = scalar_lea.hbm %s1364_s1, %s692_s17 }
  0x2d   : > { %s229_s28 = scalar_lea.vmem [#allocation6], %s675_s16  ;;  %s226_s11 = scalar_lea.sflag [#allocation7], %s1135_s6 }
  0x2e   : > { %s236_s7 = sshll.u32 %s229_s28, 4  ;;  %s928_s13 = scalar_lea.hbm %s1193_s27, 8192  ;;  %s1195_s7 = int_to_ptr.vmem [resolvable:$true] %s236_s7 }
  0x2f   : > { %p929_p10 = scmp.ne.s32.totalorder %s1193_s27, %s928_s13  ;;  %s933_s9 = scalar_lea.hbm %s1364_s1, 16384 }
  0x30   : > { %p934_p12 = scmp.lt.u32.totalorder %s1193_s27, %s1364_s1  ;;  %p935_p0 = scmp.lt.u32.totalorder %s933_s9, %s928_s13 }
  0x31   : > { %p931_p11 = pnand %p929_p10, %p900_p13  ;;  %p937_p3 = scmp.lt.u32.totalorder %s928_s13, %s1193_s27 }
  0x32   : > { %p936_p2 = por %p935_p0, %p934_p12 }
  0x33   : > { %p932_p8 = pneg %p931_p11 }
  0x34   : > { %p938_p4 = por %p937_p3, %p936_p2 }
  0x36   : > { %p939_p1 = pnand %p938_p4, %p932_p8 }
  0x38   : > { %942 = shalt.err (!%p939_p1)
}
  0x39   : > { %s943_s16 = scalar_lea.vmem %s1195_s7, 8192  ;;  %s1045_s18 = smov [#allocation6]  }
  0x3a   : > { %p944_p5 = scmp.ne.s32.totalorder %s1195_s7, %s943_s16  ;;  %s948_s26 = sshll.u32 %s1045_s18, 4  ;;  %s949_s26 = int_to_ptr.vmem [resolvable:$false] %s948_s26 }
  0x3b   : > { %s950_s28 = scalar_lea.vmem %s949_s26, 16384  ;;  %p951_p7 = scmp.lt.s32.totalorder %s1195_s7, %s949_s26 }
  0x3c   : > { %p946_p10 = pnand %p944_p5, %p900_p13  ;;  %p952_p12 = scmp.lt.s32.totalorder %s950_s28, %s943_s16 }
  0x3e   : > { %p947_p11 = pneg %p946_p10  ;;  %p953_p0 = por %p952_p12, %p951_p7 }
  0x40   : > { %p954_p2 = pnand %p953_p0, %p947_p11 }
  0x42   : > { %957 = shalt.err (!%p954_p2)
}
  0x43   : > { %s1046_s13 = smov 128   ;;  %s1047_s15 = smov 8  }
  0x44   : > { %841 = dma.hbm_to_vmem [thread:$0]  (!%p1146_p9), %s1193_s27, 8192, %s1195_s7, %s226_s11, %s1046_s13, %s1046_s13, %s1047_s15  }
  0x45   : > { %248 = sbr.rel (%p1184_p6) target bundleno = 974 (0x3ce), region = 40  ;;  %s250_s8 = sand.u32 (!%p1184_p6), 1, %s1026_s19  }
  0x46   : > { %s679_s9 = sshll.u32 (!%p1184_p6), %s250_s8, 5  ;;  %s251_s10 = scalar_lea.sflag (!%p1184_p6), [#allocation4], %s250_s8 }
  0x47   : > { %s1226_s17 = scalar_lea.vmem (!%p1184_p6), [#allocation3], %s679_s9  ;;  %p1376_p7 = scmp.ne.s32.totalorder (!%p1184_p6), %s1371_s29, 0 }
  0x4c   : > { %1009 = dma.done.wait (%p1376_p7), %s251_s10, 512  }
  0x4d   : > { %1011 = vsyncadd (%p1376_p7), %s251_s10, 4294966784  ;;  %s680_s16 = sshll.u32 %s250_s8, 9  ;;  %s260_s14 = scalar_lea.sflag [#allocation7], %s250_s8 }
  0x4e   : > { %s1232_s6 = scalar_lea.vmem [#allocation6], %s680_s16 }
  0x4f   : > { %1013 = dma.done.wait (%p1376_p7), %s260_s14, 8192  }
  0x50   : > { %1015 = vsyncadd (%p1376_p7), %s260_s14, 4294959104  ;;  %p681_p9 = scmp.ne.s32.totalorder %s1034_s21, 0 }
  0x51   : > { %v1048_v0 = vmov (!%p681_p9), 0.0  }
  0x52   : > { %295 = sbr.rel (%p681_p9) target bundleno = 89 (0x59), region = 52  ;;  %296 = vst [vmem:[#allocation2] sm:$0xff] (!%p681_p9), %v1048_v0 }
  0x59 PF: > { %v318_v1 = vld [vmem:[%s1232_s6 + $0x80] sm:$0xff]  ;;  %v319_v2 = vld [vmem:[%s1232_s6 + $0x88] sm:$0xff]  ;;  %v320_v12 = vld [vmem:[%s1232_s6 + $0x90] sm:$0xff]  ;;  %p682_p13 = scmp.ne.s32.totalorder %s1034_s21, 1 }
  0x5a   : > { %v350_v3 = vld [vmem:[%s1232_s6 + $0x180] sm:$0xff]  ;;  %v763_v4 = vpack.c.bf16 %v319_v2, %v318_v1  ;;  %v351_v5 = vld [vmem:[%s1232_s6 + $0x188] sm:$0xff]  ;;  %v321_v14 = vld [vmem:[%s1232_s6 + $0x98] sm:$0xff] }
  0x5b   : > { %v302_v6 = vld [vmem:[%s1232_s6] sm:$0xff]  ;;  %v303_v7 = vld [vmem:[%s1232_s6 + $0x8] sm:$0xff]  ;;  %v795_v8 = vpack.c.bf16 %v351_v5, %v350_v3  ;;  %v352_v15 = vld [vmem:[%s1232_s6 + $0x190] sm:$0xff]  ;;  %v767_v17 = vpack.c.bf16 %v321_v14, %v320_v12 }
  0x5c   : > { %v765_v9 = vpack.c.bf16 %v303_v7, %v302_v6  ;;  %v334_v10 = vld [vmem:[%s1232_s6 + $0x100] sm:$0xff]  ;;  %v335_v11 = vld [vmem:[%s1232_s6 + $0x108] sm:$0xff]  ;;  %764 = vmatprep.subr.bf16.mxu0 %v763_v4  ;;  %v353_v16 = vld [vmem:[%s1232_s6 + $0x198] sm:$0xff] }
  0x5d   : > { %v797_v13 = vpack.c.bf16 %v335_v11, %v334_v10  ;;  %796 = vmatprep.subr.bf16.mxu1 %v795_v8  ;;  %v799_v18 = vpack.c.bf16 %v353_v16, %v352_v15  ;;  %v304_v19 = vld [vmem:[%s1232_s6 + $0x10] sm:$0xff]  ;;  %v305_v20 = vld [vmem:[%s1232_s6 + $0x18] sm:$0xff]  ;;  %v322_v24 = vld [vmem:[%s1232_s6 + $0xa0] sm:$0xff] }
  0x5e   : > { %766 = vmatpush3.bf16.msra.mxu0 %v765_v9  ;;  %v336_v21 = vld [vmem:[%s1232_s6 + $0x110] sm:$0xff]  ;;  %v769_v22 = vpack.c.bf16 %v305_v20, %v304_v19  ;;  %v337_v23 = vld [vmem:[%s1232_s6 + $0x118] sm:$0xff]  ;;  %v323_v25 = vld [vmem:[%s1232_s6 + $0xa8] sm:$0xff] }
  0x5f   : > { %798 = vmatpush3.bf16.msra.mxu1 %v797_v13  ;;  %768 = vmatprep.subr.bf16.mxu0 %v767_v17  ;;  %v801_v26 = vpack.c.bf16 %v337_v23, %v336_v21  ;;  %v771_v27 = vpack.c.bf16 %v323_v25, %v322_v24  ;;  %v354_v28 = vld [vmem:[%s1232_s6 + $0x1a0] sm:$0xff]  ;;  %v355_v29 = vld [vmem:[%s1232_s6 + $0x1a8] sm:$0xff]  ;;  %v324_v36 = vld [vmem:[%s1232_s6 + $0xb0] sm:$0xff] }
  0x60   : > { %800 = vmatprep.subr.bf16.mxu1 %v799_v18  ;;  %v306_v30 = vld [vmem:[%s1232_s6 + $0x20] sm:$0xff]  ;;  %v803_v31 = vpack.c.bf16 %v355_v29, %v354_v28  ;;  %v307_v32 = vld [vmem:[%s1232_s6 + $0x28] sm:$0xff]  ;;  %v325_v37 = vld [vmem:[%s1232_s6 + $0xb8] sm:$0xff] }
  0x61   : > { %v338_v33 = vld [vmem:[%s1232_s6 + $0x120] sm:$0xff]  ;;  %v339_v34 = vld [vmem:[%s1232_s6 + $0x128] sm:$0xff]  ;;  %v773_v35 = vpack.c.bf16 %v307_v32, %v306_v30  ;;  %v356_v38 = vld [vmem:[%s1232_s6 + $0x1b0] sm:$0xff]  ;;  %v775_v40 = vpack.c.bf16 %v325_v37, %v324_v36 }
  0x62   : > { %770 = vmatpush3.bf16.msra.mxu0 %v769_v22  ;;  %v805_v39 = vpack.c.bf16 %v339_v34, %v338_v33  ;;  %v357_v41 = vld [vmem:[%s1232_s6 + $0x1b8] sm:$0xff]  ;;  %v308_v42 = vld [vmem:[%s1232_s6 + $0x30] sm:$0xff]  ;;  %v326_v47 = vld [vmem:[%s1232_s6 + $0xc0] sm:$0xff] }
  0x63   : > { %802 = vmatpush3.bf16.msra.mxu1 %v801_v26  ;;  %772 = vmatprep.subr.bf16.mxu0 %v771_v27  ;;  %v309_v43 = vld [vmem:[%s1232_s6 + $0x38] sm:$0xff]  ;;  %v807_v44 = vpack.c.bf16 %v357_v41, %v356_v38  ;;  %v340_v45 = vld [vmem:[%s1232_s6 + $0x130] sm:$0xff]  ;;  %v327_v48 = vld [vmem:[%s1232_s6 + $0xc8] sm:$0xff] }
  0x64   : > { %804 = vmatprep.subr.bf16.mxu1 %v803_v31  ;;  %v341_v46 = vld [vmem:[%s1232_s6 + $0x138] sm:$0xff]  ;;  %v358_v49 = vld [vmem:[%s1232_s6 + $0x1c0] sm:$0xff]  ;;  %v359_v50 = vld [vmem:[%s1232_s6 + $0x1c8] sm:$0xff]  ;;  %v777_v51 = vpack.c.bf16 %v309_v43, %v308_v42  ;;  %v779_v53 = vpack.c.bf16 %v327_v48, %v326_v47 }
  0x65   : > { %v809_v52 = vpack.c.bf16 %v341_v46, %v340_v45  ;;  %v310_v54 = vld [vmem:[%s1232_s6 + $0x40] sm:$0xff]  ;;  %v311_v55 = vld [vmem:[%s1232_s6 + $0x48] sm:$0xff]  ;;  %v811_v57 = vpack.c.bf16 %v359_v50, %v358_v49  ;;  %v328_v59 = vld [vmem:[%s1232_s6 + $0xd0] sm:$0xff]  ;;  %v523_v49 = vlaneseq (!%p682_p13) }
  0x66   : > { %774 = vmatpush3.bf16.msra.mxu0 %v773_v35  ;;  %v342_v56 = vld [vmem:[%s1232_s6 + $0x140] sm:$0xff]  ;;  %v343_v58 = vld [vmem:[%s1232_s6 + $0x148] sm:$0xff]  ;;  %v329_v60 = vld [vmem:[%s1232_s6 + $0xd8] sm:$0xff]  ;;  %v781_v63 = vpack.c.bf16 %v311_v55, %v310_v54 }
  0x67   : > { %806 = vmatpush3.bf16.msra.mxu1 %v805_v39  ;;  %776 = vmatprep.subr.bf16.mxu0 %v775_v40  ;;  %v360_v61 = vld [vmem:[%s1232_s6 + $0x1d0] sm:$0xff]  ;;  %v361_v62 = vld [vmem:[%s1232_s6 + $0x1d8] sm:$0xff]  ;;  %v813_v0 = vpack.c.bf16 %v343_v58, %v342_v56  ;;  %v783_v1 = vpack.c.bf16 %v329_v60, %v328_v59  ;;  %v330_v7 = vld [vmem:[%s1232_s6 + $0xe0] sm:$0xff]  ;;  %v524_v50 = vand.u32 (!%p682_p13), 127, %v523_v49 }
  0x68   : > { %808 = vmatprep.subr.bf16.mxu1 %v807_v44  ;;  %v312_v2 = vld [vmem:[%s1232_s6 + $0x50] sm:$0xff]  ;;  %v313_v3 = vld [vmem:[%s1232_s6 + $0x58] sm:$0xff]  ;;  %v815_v5 = vpack.c.bf16 %v361_v62, %v360_v61  ;;  %v331_v8 = vld [vmem:[%s1232_s6 + $0xe8] sm:$0xff] }
  0x69   : > { %v344_v4 = vld [vmem:[%s1232_s6 + $0x150] sm:$0xff]  ;;  %v345_v6 = vld [vmem:[%s1232_s6 + $0x158] sm:$0xff]  ;;  %v362_v9 = vld [vmem:[%s1232_s6 + $0x1e0] sm:$0xff]  ;;  %v785_v11 = vpack.c.bf16 %v313_v3, %v312_v2  ;;  %v787_v15 = vpack.c.bf16 %v331_v8, %v330_v7  ;;  %v1049_v2 = vmov (!%p682_p13), 0.0   ;;  %vm570_vm4 = vcmp.eq.s32.totalorder (!%p682_p13), %v524_v50, 10 }
  0x6a   : > { %778 = vmatpush3.bf16.msra.mxu0 %v777_v51  ;;  %v363_v10 = vld [vmem:[%s1232_s6 + $0x1e8] sm:$0xff]  ;;  %v314_v12 = vld [vmem:[%s1232_s6 + $0x60] sm:$0xff]  ;;  %v817_v14 = vpack.c.bf16 %v345_v6, %v344_v4  ;;  %v301_v18 = vld [vmem:[%s1226_s17 + $0x18] sm:$0xff] }
  0x6b   : > { %810 = vmatpush3.bf16.msra.mxu1 %v809_v52  ;;  %780 = vmatprep.subr.bf16.mxu0 %v779_v53  ;;  %v315_v13 = vld [vmem:[%s1232_s6 + $0x68] sm:$0xff]  ;;  %v346_v16 = vld [vmem:[%s1232_s6 + $0x160] sm:$0xff]  ;;  %v819_v19 = vpack.c.bf16 %v363_v10, %v362_v9  ;;  %v332_v21 = vld [vmem:[%s1232_s6 + $0xf0] sm:$0xff] }
  0x6c   : > { %812 = vmatprep.subr.bf16.mxu1 %v811_v57  ;;  %v299_v17 = vld [vmem:[%s1226_s17 + $0x8] sm:$0xff]  ;;  %v333_v22 = vld [vmem:[%s1232_s6 + $0xf8] sm:$0xff]  ;;  %v364_v23 = vld [vmem:[%s1232_s6 + $0x1f0] sm:$0xff]  ;;  %500 = vmatprep.mubr.f32.mxu1 %v301_v18  ;;  %v789_v25 = vpack.c.bf16 %v315_v13, %v314_v12 }
  0x6d   : > { %v347_v20 = vld [vmem:[%s1232_s6 + $0x168] sm:$0xff]  ;;  %430 = vmatprep.mubr.f32.mxu0 %v299_v17  ;;  %v365_v24 = vld [vmem:[%s1232_s6 + $0x1f8] sm:$0xff]  ;;  %v791_v27 = vpack.c.bf16 %v333_v22, %v332_v21  ;;  %v316_v28 = vld [vmem:[%s1232_s6 + $0x70] sm:$0xff] }
  0x6e   : > { %782 = vmatpush3.bf16.msra.mxu0 %v781_v63  ;;  %v821_v26 = vpack.c.bf16 %v347_v20, %v346_v16  ;;  %v317_v29 = vld [vmem:[%s1232_s6 + $0x78] sm:$0xff]  ;;  %v823_v30 = vpack.c.bf16 %v365_v24, %v364_v23  ;;  %v348_v31 = vld [vmem:[%s1232_s6 + $0x170] sm:$0xff]  ;;  %v298_v35 = vld [vmem:[%s1226_s17] sm:$0xff] }
  0x6f   : > { %814 = vmatpush3.bf16.msra.mxu1 %v813_v0  ;;  %784 = vmatprep.subr.bf16.mxu0 %v783_v1  ;;  %v349_v32 = vld [vmem:[%s1232_s6 + $0x178] sm:$0xff]  ;;  %v793_v33 = vpack.c.bf16 %v317_v29, %v316_v28  ;;  %v300_v36 = vld [vmem:[%s1226_s17 + $0x10] sm:$0xff] }
  0x70   : > { %816 = vmatprep.subr.bf16.mxu1 %v815_v5  ;;  %v825_v34 = vpack.c.bf16 %v349_v32, %v348_v31  ;;  %v297_v43 = vld [vmem:[#allocation2] sm:$0xff] }
  0x71   : > { %v683_v47 = vld [vmem:[%s1365_s2] ss:$0 sm:$0xff] (!%p682_p13) }
  0x72   : > { %786 = vmatpush3.bf16.msra.mxu0 %v785_v11  ;;  %v686_v0 = vld [vmem:[%s1367_s4] ss:$0 sm:$0xff] (!%p682_p13) }
  0x73   : > { %818 = vmatpush3.bf16.msra.mxu1 %v817_v14  ;;  %788 = vmatprep.subr.bf16.mxu0 %v787_v15  ;;  %v685_v1 = vld [vmem:[%s1366_s3] ss:$0 sm:$0xff] (!%p682_p13) }
  0x74   : > { %820 = vmatprep.subr.bf16.mxu1 %v819_v19 }
  0x76   : > { %790 = vmatpush3.bf16.msra.mxu0 %v789_v25 }
  0x77   : > { %822 = vmatpush3.bf16.msra.mxu1 %v821_v26  ;;  %792 = vmatprep.subr.bf16.mxu0 %v791_v27 }
  0x78   : > { %824 = vmatprep.subr.bf16.mxu1 %v823_v30 }
  0x7a   : > { %794 = vmatpush3.bf16.msra.mxu0 %v793_v33 }
  0x7b   : > { %826 = vmatpush3.bf16.msra.mxu1 %v825_v34 }
  0x7d   : > { %431 = vmatmul.mubr.f32.vlgmr.msra.gmra.mrb[0].mxu0 %v298_v35 }
  0x7e   : > { %501 = vmatmul.mubr.f32.vlgmr.msra.gmra.mrb[0].mxu1 %v300_v36 }
 0x150   : > { %v725_v37 = vpop.f32.mrb[0].mxu0 }
 0x151   : > { %v760_v38 = vpop.f32.mrb[0].mxu1  ;;  %v726_v39 = vpop.f32.mrb[1].mxu0 }
 0x152   : > { %v727_v40 = vadd.f32 %v726_v39, %v725_v37  ;;  %v761_v41 = vpop.f32.mrb[1].mxu1 }
 0x153   : > { %v762_v42 = vadd.f32 %v761_v41, %v760_v38  ;;  %511 = sbr.rel (%p682_p13) target bundleno = 949 (0x3b5), region = 56 }
 0x155   : > { %v503_v44 = vadd.f32 %v762_v42, %v727_v40 }
 0x157   : > { %v506_v45 = vadd.f32 %v503_v44, %v297_v43 }
 0x159   : > { %507 = vst [vmem:[#allocation2] sm:$0xff] %v506_v45 }
 0x160   : > { %v512_v46 = vld [vmem:[#allocation2] sm:$0xff] }
 0x161   : > { %v520_v48 = vadd.f32 %v683_v47, %v512_v46 }
 0x163   : > { %521 = vmax.xlane.f32.xlu0 %v520_v48 }
 0x1f0   : > { %v522_v51 = vpop.xlane.xlu0 %521 }
 0x1f1   : > { %vm525_vm0 = vcmp.eq.f32.partialorder %v520_v48, %v522_v51 }
 0x1f2   : > { %v526_v52 = vsel %vm525_vm0, %v524_v50, 128 }
 0x1f3   : > { %v528_v53 = vshra.s32 %v526_v52, 16  ;;  %v527_v55 = vand.u32 65535, %v526_v52 }
 0x1f5   : > { %v530_v54 = vcvt.s32.f32 %v528_v53  ;;  %v529_v57 = vcvt.s32.f32 %v527_v55 }
 0x1f7   : > { %531 = vmin.xlane.f32.xlu0 %v530_v54 }
 0x284   : > { %v532_v56 = vpop.xlane.xlu0 %531 }
 0x285   : > { %vm533_vm1 = vcmp.eq.f32.partialorder %v530_v54, %v532_v56  ;;  %v538_v59 = vcvt.f32.s32 %v532_v56 }
 0x286   : > { %v534_v58 = vsel %vm533_vm1, %v529_v57, inf }
 0x287   : > { %535 = vmin.xlane.f32.xlu1 %v534_v58  ;;  %v539_v61 = vshll.u32 %v538_v59, 16 }
 0x314   : > { %v536_v60 = vpop.xlane.xlu1 %535 }
 0x315   : > { %v537_v62 = vcvt.f32.s32 %v536_v60 }
 0x317   : > { %v540_v63 = vadd.s32 %v539_v61, %v537_v62 }
 0x319   : > { %vm541_vm2 = vcmp.eq.s32.totalorder %v524_v50, %v540_v63 }
 0x31a   : > { %v684_v3 = vsel %vm541_vm2, 1.0, %v1049_v2 }
 0x31b   : > { %v561_v4 = vmul.f32 %v686_v0, %v684_v3  ;;  %v551_v5 = vmul.f32 %v685_v1, %v684_v3 }
 0x31d   : > { %562 = vadd.xlane.f32.xlu0 %v561_v4  ;;  %552 = vadd.xlane.f32.xlu1 %v551_v5 }
 0x3aa   : > { %v563_v6 = vpop.xlane.xlu0 %562  ;;  %v553_v7 = vpop.xlane.xlu1 %552 }
 0x3ab   : > { %v565_v8 = vand.u32 2147483647, %v563_v6  ;;  %v564_v9 = vand.u32 2147483647, %v553_v7 }
 0x3ad   : > { %vm566_vm3 = vcmp.gt.f32.partialorder %v564_v9, %v565_v8 }
 0x3ae   : > { %v567_v10 = vsel %vm566_vm3, %v553_v7, %v563_v6 }
 0x3af   : > { %v568_v11 = vadd.f32 1.0, %v567_v10 }
 0x3b1   : > { %v569_v12 = vmul.f32 %v568_v11, %v522_v51 }
 0x3b3   : > { %v571_v13 = vsel %vm570_vm4, %v569_v12, %v520_v48 }
 0x3b4   : > { %572 = vst [vmem:[#allocation8] sm:$0xff] %v571_v13 }
 0x3b5 PF: > { %p1319_p6 = scmp.eq.s32.totalorder %s669_s24, 1  ;;  %s1050_s26 = smov [#allocation8]  }
 0x3b6   : > { %s582_s28 = sshll.u32 %s1050_s26, 4  ;;  %s583_s28 = int_to_ptr.vmem [resolvable:$true] %s582_s28 }
 0x3b7   : > { %s958_s13 = scalar_lea.vmem %s583_s28, 128  ;;  %p965_p1 = scmp.lt.s32.totalorder %s583_s28, %s583_s28 }
 0x3b8   : > { %p959_p8 = scmp.ne.s32.totalorder %s583_s28, %s958_s13  ;;  %p966_p5 = scmp.lt.s32.totalorder %s958_s13, %s958_s13 }
 0x3ba   : > { %p960_p3 = pnand %p959_p8, %p1319_p6  ;;  %p967_p10 = por %p966_p5, %p965_p1 }
 0x3bc   : > { %p961_p4 = pneg %p960_p3 }
 0x3be   : > { %p968_p11 = pnand %p967_p10, %p961_p4 }
 0x3c0   : > { %971 = shalt.err (!%p968_p11)
}
 0x3c1   : > { %s972_s24 = scalar_lea.hbm %s1368_s5, 128 }
 0x3c2   : > { %p973_p12 = scmp.ne.s32.totalorder %s1368_s5, %s972_s24  ;;  %p978_p7 = scmp.lt.u32.totalorder %s972_s24, %s1368_s5 }
 0x3c4   : > { %p974_p0 = pnand %p973_p12, %p1319_p6 }
 0x3c6   : > { %p975_p2 = pneg %p974_p0 }
 0x3c8   : > { %p980_p9 = pnand %p978_p7, %p975_p2 }
 0x3ca   : > { %983 = shalt.err (!%p980_p9)
}
 0x3cb   : > { %832 = dma.vmem_to_hbm [thread:$0]  (%p1319_p6), %s583_s28, 128, %s1368_s5, [#allocation5]  }
 0x3cc   : > { %1017 = dma.done.wait (%p1319_p6), [#allocation5], 128  }
 0x3cd   : > { %1019 = vsyncadd (%p1319_p6), [#allocation5], 4294967168 }
 0x3ce PF: > { %s22_s23 = sadd.s32 1, %s1042_s23   ;;  %s1378_s18 = smov %s1026_s19 }
 0x3cf   : > { %p19_p13 = scmp.ge.s32.totalorder %s22_s23, 4   ;;  %s1379_s19 = smov %s1030_s20 }
 0x3d0   : > { %s1380_s20 = smov %s1132_s30  ;;  %s1381_s21 = smov %s1038_s22 }
 0x3d1   : > { %s1382_s22 = smov %s1384_s25  ;;  %21 = sbr.rel (!%p19_p13) target bundleno = 7 (0x7), region = 99 }
 0x3d8   :  { %595 = vsyncpa [#allocation4], 1 }
 0x3d9   :  { %597 = vsyncpa [#allocation4 + $0x1], 1 }
 0x3da   :  { %598 = vsyncpa [#allocation7], 1 }
 0x3db   :  { %600 = vsyncpa [#allocation7 + $0x1], 1 }
 0x3dc   :  { %601 = vsyncpa [#allocation5], 1 }
 0x3dd   :  { %603 = vsyncpa [#allocation5 + $0x1], 1 }

</bundles_post_ra>
